<compile_context>
chip_gen: v7x
topology: tpu7x:2x2x1
jax: 0.10.0
libtpu: 0.0.40
codegen_flags: <defaults>
</compile_context>

<pallas_src>
from typing import Optional, Sequence

import jax
import jax.numpy as jnp
from jax.experimental import pallas as pl
from jax.experimental.pallas import tpu as pltpu


# ----------------------------------------------------------------------------- kernel
def _fused_linear_kernel(x_ref, w_ref, b_ref, o_ref, acc_ref):
    """One (tm, tn) output tile; grid axis 2 reduces over K.  w_ref is (tk, tn): no transpose."""
    k = pl.program_id(2)

    @pl.when(k == 0)
    def _():
        acc_ref[...] = jnp.zeros_like(acc_ref)

    # Pure MXU matmul with a resident f32 accumulator (mask already folded into the weight).
    acc_ref[...] += jnp.dot(x_ref[...], w_ref[...], preferred_element_type=jnp.float32)

    @pl.when(k == pl.num_programs(2) - 1)
    def _():
        o_ref[...] = (acc_ref[...] + b_ref[...].astype(jnp.float32)).astype(o_ref.dtype)


# ----------------------------------------------------------------------------- tiling helpers
def _round_up(x: int, m: int) -> int:
    return ((x + m - 1) // m) * m


def _sublane_align(dtype) -> int:
    # f32 -> 8, bf16 -> 16, int8/fp8 -> 32 (sublane packing).
    return max(8, 32 // jnp.dtype(dtype).itemsize)


def _choose_tile(dim: int, pref: int, align: int) -> int:
    """Tile = pref when the dim is large enough; otherwise the dim rounded up to `align`.
    The array is zero-padded up to a multiple of the chosen tile, so blocks stay bounded."""
    return pref if dim >= pref else _round_up(dim, align)


# Below this many MACs a single fused XLA op beats Pallas launch/DMA overhead.
_TINY_PROBLEM_MACS = 128 * 128 * 128


# ----------------------------------------------------------------------------- wrapper
def fused_linear_matmul(x2d: jnp.ndarray, w_t: jnp.ndarray, bias: jnp.ndarray) -> jnp.ndarray:
    """y = x2d @ w_t + bias via Pallas.  x2d:(M,K), w_t:(K,N) (mask already fused), bias:(N,)."""
    M, K = x2d.shape
    K2, N = w_t.shape
    assert K == K2 and bias.shape == (N,)

    # Tiny problems: skip the kernel, one fused XLA op is cheaper.
    if M * N * K < _TINY_PROBLEM_MACS:
        return x2d @ w_t + bias

    tm = _choose_tile(M, 256, _sublane_align(x2d.dtype))
    tn = _choose_tile(N, 256, 128)
    tk = _choose_tile(K, 512, 128)

    Mp, Np, Kp = _round_up(M, tm), _round_up(N, tn), _round_up(K, tk)

    # Zero-pad to tile multiples (zeros in K contribute nothing; padded M rows / N cols are sliced off).
    xp = x2d if (Mp == M and Kp == K) else jnp.pad(x2d, ((0, Mp - M), (0, Kp - K)))
    wp = w_t if (Kp == K and Np == N) else jnp.pad(w_t, ((0, Kp - K), (0, Np - N)))
    bp = bias if Np == N else jnp.pad(bias, (0, Np - N))
    bias2d = bp.reshape(1, Np)

    grid = (Mp // tm, Np // tn, Kp // tk)

    out = pl.pallas_call(
        _fused_linear_kernel,
        out_shape=jax.ShapeDtypeStruct((Mp, Np), x2d.dtype),
        grid_spec=pltpu.PrefetchScalarGridSpec(
            num_scalar_prefetch=0,
            grid=grid,
            in_specs=[
                pl.BlockSpec((tm, tk), lambda i, j, k: (i, k)),   # x tile
                pl.BlockSpec((tk, tn), lambda i, j, k: (k, j)),   # fused, pre-transposed weight tile
                pl.BlockSpec((1, tn), lambda i, j, k: (0, j)),    # bias tile
            ],
            out_specs=pl.BlockSpec((tm, tn), lambda i, j, k: (i, j)),
            scratch_shapes=[pltpu.VMEM((tm, tn), jnp.float32)],
        ),
        compiler_params=pltpu.CompilerParams(
            dimension_semantics=("parallel", "parallel", "arbitrary"),
            # Actual use is only a few MiB at these tiles; headroom stays under v7x's 64 MiB physical.
            vmem_limit_bytes=48 * 1024 * 1024,
        ),
    )(xp, wp, bias2d)

    if Mp != M or Np != N:
        out = out[:M, :N]
    return out


class FusedLinearPallas:
    """JAX/Pallas port of the PyTorch FusedLinear module (forward pass)."""

    def __init__(self,
                 in_feature_list,
                 out_feature_list,
                 bias: bool = True,
                 mask: Optional[jnp.ndarray] = None,
                 key: jax.Array = None,
                 dtype=jnp.float32):
        if isinstance(in_feature_list, int):
            in_feature_list = [in_feature_list]
        if isinstance(out_feature_list, int):
            out_feature_list = [out_feature_list]
        self.in_feature_list = list(in_feature_list)
        self.out_feature_list = list(out_feature_list)
        self.total_in = sum(self.in_feature_list)
        self.total_out = sum(self.out_feature_list)
        self.use_bias = bias

        if key is None:
            key = jax.random.PRNGKey(0)
        kw, kb = jax.random.split(key)
        # Same init scheme as nn.Linear: uniform in [-1/sqrt(fan_in), 1/sqrt(fan_in)].
        bound = 1.0 / (self.total_in ** 0.5)
        self.weight = jax.random.uniform(
            kw, (self.total_out, self.total_in), dtype, minval=-bound, maxval=bound)
        if bias:
            self.bias = jax.random.uniform(
                kb, (self.total_out,), dtype, minval=-bound, maxval=bound)
        else:
            self.bias = jnp.zeros((self.total_out,), dtype)

        self.use_mask = mask is not None
        if self.use_mask:
            assert mask.shape == self.weight.shape, (
                f"mask shape {mask.shape} does not match weight shape {self.weight.shape}")
            self.mask = mask.astype(dtype)
        else:
            self.mask = jnp.ones_like(self.weight)

        # Pre-fuse the static mask and pre-transpose ONCE: the kernel streams a single
        # (K, N) weight tensor, so no per-step mask DMA / multiply and no in-kernel transpose.
        fused_w = self.weight * self.mask if self.use_mask else self.weight
        self.w_t = jnp.asarray(fused_w.T)     # (total_in, total_out)
        # NOTE: on v6e/v7x, casting x and self.w_t to bfloat16 (f32 accumulator kept in-kernel)
        # roughly doubles throughput if reduced precision is acceptable.

    def __call__(self, *inputs: Sequence[jnp.ndarray]):
        if len(inputs) != len(self.in_feature_list):
            raise ValueError(
                f"expected inputs of size {self.in_feature_list}, "
                f"got {[v.shape[-1] for v in inputs]}")
        if len(self.in_feature_list) > 1:
            x = jnp.concatenate(inputs, axis=-1)
        else:
            x = inputs[0]
        if x.shape[-1] != self.total_in:
            raise ValueError(
                f"expected inputs of size {self.in_feature_list}, "
                f"got {[v.shape[-1] for v in inputs]}")

        batch_shape = x.shape[:-1]
        x2d = x.reshape(-1, self.total_in)
        y2d = fused_linear_matmul(x2d, self.w_t, self.bias)
        y = y2d.reshape(*batch_shape, self.total_out)

        if len(self.out_feature_list) == 1:
            return y
        # torch.split along last dim into out_feature_list chunks
        splits = []
        off = 0
        for n in self.out_feature_list:
            splits.append(y[..., off:off + n])
            off += n
        return tuple(splits)


if __name__ == "__main__":
    key = jax.random.PRNGKey(0)
    k_mask, k_x1, k_x2, k_params = jax.random.split(key, 4)

    # Small but kernel-exercising shapes: two inputs of widths 64 and 192 (total_in=256),
    # two outputs of widths 128 and 128 (total_out=256), batch=(2, 128) -> M=256 rows.
    in_feats = [64, 192]
    out_feats = [128, 128]
    batch, seq = 2, 128

    # Deterministic binary mask on the weight (e.g. autoregressive-style structure).
    mask = (jax.random.uniform(k_mask, (sum(out_feats), sum(in_feats))) > 0.3).astype(jnp.float32)

    layer = FusedLinearPallas(in_feats, out_feats, bias=True, mask=mask, key=k_params)

    x1 = jax.random.normal(k_x1, (batch, seq, in_feats[0]), jnp.float32)
    x2 = jax.random.normal(k_x2, (batch, seq, in_feats[1]), jnp.float32)

    y1, y2 = layer(x1, x2)
    jax.block_until_ready((y1, y2))

    # Pure-JAX reference check (highest-precision matmul).
    x_cat = jnp.concatenate([x1, x2], axis=-1)
    w_masked = layer.weight * layer.mask
    ref = jnp.einsum("bsk,nk->bsn", x_cat, w_masked,
                     precision=jax.lax.Precision.HIGHEST) + layer.bias
    ref1, ref2 = ref[..., :out_feats[0]], ref[..., out_feats[0]:]
    assert y1.shape == (batch, seq, out_feats[0]) and y2.shape == (batch, seq, out_feats[1])
    assert jnp.allclose(y1, ref1, atol=1e-2, rtol=1e-2)
    assert jnp.allclose(y2, ref2, atol=1e-2, rtol=1e-2)

    print("KERNEL_OK")
</pallas_src>

<mosaic_0001>
module attributes {stable_mosaic.version = 11 : i64} {
  func.func @_fused_linear_kernel(%arg0: i32, %arg1: i32, %arg2: i32, %arg3: memref<256x256xf32, #tpu.memory_space<vmem>>, %arg4: memref<256x256xf32, #tpu.memory_space<vmem>>, %arg5: memref<1x256xf32, #tpu.memory_space<vmem>>, %arg6: memref<256x256xf32, #tpu.memory_space<vmem>>, %arg7: memref<256x256xf32, #tpu.memory_space<vmem>>) attributes {dimension_semantics = [#tpu.dimension_semantics<parallel>, #tpu.dimension_semantics<parallel>, #tpu.dimension_semantics<arbitrary>], iteration_bounds = array<i64: 1, 1, 1>, scalar_prefetch = 0 : i64, scratch_operands = 1 : i64, tpu.core_type = #tpu.core_type<tc>, window_params = [{transform_indices = @transform_0, window_bounds = array<i64: 256, 256>}, {transform_indices = @transform_1, window_bounds = array<i64: 256, 256>}, {transform_indices = @transform_2, window_bounds = array<i64: 1, 256>}, {transform_indices = @transform_3, window_bounds = array<i64: 256, 256>}]} {
    %c0_i32 = arith.constant 0 : i32
    %0 = arith.cmpi eq, %arg2, %c0_i32 : i32
    %1 = arith.extui %0 : i1 to i32
    %c0_i32_0 = arith.constant 0 : i32
    %2 = arith.cmpi ne, %1, %c0_i32_0 : i32
    scf.if %2 {
      %cst_10 = arith.constant 0.000000e+00 : f32
      %12 = vector.broadcast %cst_10 : f32 to vector<256x256xf32>
      %c0_11 = arith.constant 0 : index
      %c0_12 = arith.constant 0 : index
      %13 = vector.load %arg7[%c0_11, %c0_12] : memref<256x256xf32, #tpu.memory_space<vmem>>, vector<256x256xf32>
      tpu.vector_store %arg7[%c0_11, %c0_12], %12 {strides = array<i32>} : memref<256x256xf32, #tpu.memory_space<vmem>>, vector<256x256xf32>,
    } else {
    }
    %c0 = arith.constant 0 : index
    %c0_1 = arith.constant 0 : index
    %3 = vector.load %arg7[%c0, %c0_1] : memref<256x256xf32, #tpu.memory_space<vmem>>, vector<256x256xf32>
    %c0_2 = arith.constant 0 : index
    %c0_3 = arith.constant 0 : index
    %4 = vector.load %arg3[%c0_2, %c0_3] : memref<256x256xf32, #tpu.memory_space<vmem>>, vector<256x256xf32>
    %c0_4 = arith.constant 0 : index
    %c0_5 = arith.constant 0 : index
    %5 = vector.load %arg4[%c0_4, %c0_5] : memref<256x256xf32, #tpu.memory_space<vmem>>, vector<256x256xf32>
    %cst = arith.constant dense<0.000000e+00> : vector<256x256xf32>
    %6 = tpu.matmul %4, %5, %cst {dimension_numbers = #tpu.dot_dimension_numbers<[1], [0], [0], [1], [0, 0, 1, 1], [], []>} : vector<256x256xf32>, vector<256x256xf32>, vector<256x256xf32> -> vector<256x256xf32>
    %7 = arith.addf %3, %6 : vector<256x256xf32>
    %c0_6 = arith.constant 0 : index
    %c0_7 = arith.constant 0 : index
    %8 = vector.load %arg7[%c0_6, %c0_7] : memref<256x256xf32, #tpu.memory_space<vmem>>, vector<256x256xf32>
    tpu.vector_store %arg7[%c0_6, %c0_7], %7 {strides = array<i32>} : memref<256x256xf32, #tpu.memory_space<vmem>>, vector<256x256xf32>,
    %c0_i32_8 = arith.constant 0 : i32
    %9 = arith.cmpi eq, %arg2, %c0_i32_8 : i32
    %10 = arith.extui %9 : i1 to i32
    %c0_i32_9 = arith.constant 0 : i32
    %11 = arith.cmpi ne, %10, %c0_i32_9 : i32
    scf.if %11 {
      %c0_10 = arith.constant 0 : index
      %c0_11 = arith.constant 0 : index
      %12 = vector.load %arg7[%c0_10, %c0_11] : memref<256x256xf32, #tpu.memory_space<vmem>>, vector<256x256xf32>
      %c0_12 = arith.constant 0 : index
      %c0_13 = arith.constant 0 : index
      %13 = vector.load %arg5[%c0_12, %c0_13] : memref<1x256xf32, #tpu.memory_space<vmem>>, vector<1x256xf32>
      %14 = vector.broadcast %13 : vector<1x256xf32> to vector<256x256xf32>
      %15 = arith.addf %12, %14 : vector<256x256xf32>
      %c0_14 = arith.constant 0 : index
      %c0_15 = arith.constant 0 : index
      %16 = vector.load %arg6[%c0_14, %c0_15] : memref<256x256xf32, #tpu.memory_space<vmem>>, vector<256x256xf32>
      tpu.vector_store %arg6[%c0_14, %c0_15], %15 {strides = array<i32>} : memref<256x256xf32, #tpu.memory_space<vmem>>, vector<256x256xf32>,
    } else {
    }
    return
  }
  func.func @transform_0(%arg0: i32, %arg1: i32, %arg2: i32) -> (i32, i32) {
    %c0_i32 = arith.constant 0 : i32
    return %arg0, %arg2 : i32, i32
  }
  func.func @transform_1(%arg0: i32, %arg1: i32, %arg2: i32) -> (i32, i32) {
    %c0_i32 = arith.constant 0 : i32
    return %arg2, %arg1 : i32, i32
  }
  func.func @transform_2(%arg0: i32, %arg1: i32, %arg2: i32) -> (i32, i32) {
    %c0_i32 = arith.constant 0 : i32
    %c0_i32_0 = arith.constant 0 : i32
    return %c0_i32, %arg1 : i32, i32
  }
  func.func @transform_3(%arg0: i32, %arg1: i32, %arg2: i32) -> (i32, i32) {
    %c0_i32 = arith.constant 0 : i32
    return %arg0, %arg1 : i32, i32
  }
}

</mosaic_0001>

<bundles_post_ra>
// kernel: tpu_custom_call.1
= control target key start
LH: loop header
LB: loop body
LE: loop exit
PB: predicated region body
PF: predicated region fallthrough
CT: control target
= control target key end

     0   :  { %8 = vsyncpa [#allocation4], 0  ;;  %s1227_s0 = inlined_call_operand.hbm [shape: f32[256,256], index: 0, kind: input, shape index: {}]   ;;  %s1228_s1 = inlined_call_operand.hbm [shape: f32[256,256], index: 1, kind: input, shape index: {}]   ;;  %s1229_s2 = inlined_call_operand.vmem [shape: f32[1,256], index: 2, kind: input, shape index: {}]   ;;  %s1230_s3 = inlined_call_operand.hbm [shape: f32[256,256], index: 3, kind: output, shape index: {}]  }
   0x1   :  { %9 = vsyncpa [#allocation7], 0 }
   0x2   :  { %10 = vsyncpa [#allocation5], 0  ;;  %s1086_s12 = smov [#allocation3]   ;;  %s1014_s16 = scalar_lea.hbm %s1227_s0, 8192 }
   0x3   :  { %s16_s13 = sshll.u32 %s1086_s12, 4  ;;  %p1015_p0 = scmp.ne.s32.totalorder %s1227_s0, %s1014_s16  ;;  %s17_s13 = int_to_ptr.vmem [resolvable:$true] %s16_s13 }
   0x4   :  { %p1018_p1 = scmp.lt.u32.totalorder %s1014_s16, %s1227_s0 }
   0x6   :  { %p1020_p2 = pnand %p1018_p1, %p1015_p0 }
   0x8   :  { %1023 = shalt.err (!%p1020_p2)
}
   0x9   :  { %s1024_s21 = scalar_lea.vmem %s17_s13, 8192  ;;  %p1029_p4 = scmp.lt.s32.totalorder %s17_s13, %s17_s13 }
   0xa   :  { %p1025_p3 = scmp.ne.s32.totalorder %s17_s13, %s1024_s21  ;;  %p1030_p5 = scmp.lt.s32.totalorder %s1024_s21, %s1024_s21 }
   0xc   :  { %p1031_p6 = por %p1030_p5, %p1029_p4 }
   0xe   :  { %p1032_p7 = pnand %p1031_p6, %p1025_p3 }
  0x10   :  { %1035 = shalt.err (!%p1032_p7)
}
  0x11   :  { %s1087_s22 = smov 256   ;;  %s1088_s23 = smov 16  }
  0x12   :  { %22 = dma.hbm_to_vmem [thread:$0]  %s1227_s0, 8192, %s17_s13, [#allocation4], %s1087_s22, %s1087_s22, %s1088_s23  }
  0x13   :  { %s1089_s26 = smov [#allocation6]   ;;  %s1036_s30 = scalar_lea.hbm %s1228_s1, 8192 }
  0x14   :  { %s28_s27 = sshll.u32 %s1089_s26, 4  ;;  %p1037_p8 = scmp.ne.s32.totalorder %s1228_s1, %s1036_s30  ;;  %s29_s27 = int_to_ptr.vmem [resolvable:$true] %s28_s27 }
  0x15   :  { %p1040_p9 = scmp.lt.u32.totalorder %s1036_s30, %s1228_s1 }
  0x17   :  { %p1042_p10 = pnand %p1040_p9, %p1037_p8 }
  0x19   :  { %1045 = shalt.err (!%p1042_p10)
}
  0x1a   :  { %s1046_s8 = scalar_lea.vmem %s29_s27, 8192  ;;  %p1051_p12 = scmp.lt.s32.totalorder %s29_s27, %s29_s27 }
  0x1b   :  { %p1047_p11 = scmp.ne.s32.totalorder %s29_s27, %s1046_s8  ;;  %p1052_p13 = scmp.lt.s32.totalorder %s1046_s8, %s1046_s8 }
  0x1d   :  { %p1053_p0 = por %p1052_p13, %p1051_p12 }
  0x1f   :  { %p1054_p1 = pnand %p1053_p0, %p1047_p11 }
  0x21   :  { %1057 = shalt.err (!%p1054_p1)
}
  0x22   :  { %34 = dma.hbm_to_vmem [thread:$0]  %s1228_s1, 8192, %s29_s27, [#allocation7], %s1087_s22, %s1087_s22, %s1088_s23  }
  0x23   :  { %1080 = dma.done.wait [#allocation4], 8192  }
  0x24   :  { %1081 = vsyncadd [#allocation4], 4294959104 }
  0x25   :  { %1082 = dma.done.wait [#allocation7], 8192  }
  0x26   :  { %1083 = vsyncadd [#allocation7], 4294959104  ;;  %v240_v0 = vld [vmem:[#allocation6 + $0x8] sm:$0xff]  ;;  %v242_v1 = vld [vmem:[#allocation6 + $0x18] sm:$0xff] }
  0x27   :  { %v239_v2 = vld [vmem:[#allocation6] sm:$0xff]  ;;  %v913_v3 = vpack.c.bf16 %v242_v1, %v240_v0  ;;  %v241_v4 = vld [vmem:[#allocation6 + $0x10] sm:$0xff]  ;;  %v244_v5 = vld [vmem:[#allocation6 + $0x28] sm:$0xff] }
  0x28   :  { %v246_v6 = vld [vmem:[#allocation6 + $0x38] sm:$0xff]  ;;  %v915_v7 = vpack.c.bf16 %v241_v4, %v239_v2  ;;  %v243_v9 = vld [vmem:[#allocation6 + $0x20] sm:$0xff]  ;;  %v245_v10 = vld [vmem:[#allocation6 + $0x30] sm:$0xff] }
  0x29   :  { %v917_v8 = vpack.c.bf16 %v246_v6, %v244_v5  ;;  %v248_v11 = vld [vmem:[#allocation6 + $0x48] sm:$0xff]  ;;  %914 = vmatprep.subr.bf16.mxu0 %v913_v3  ;;  %977 = vmatprep.subr.bf16.mxu1 %v913_v3  ;;  %v250_v12 = vld [vmem:[#allocation6 + $0x58] sm:$0xff]  ;;  %v919_v13 = vpack.c.bf16 %v245_v10, %v243_v9  ;;  %v247_v15 = vld [vmem:[#allocation6 + $0x40] sm:$0xff] }
  0x2a   :  { %916 = vmatpush1.bf16.msra.mxu0 %v915_v7  ;;  %993 = vmatpush1.bf16.msra.mxu1 %v915_v7  ;;  %v921_v14 = vpack.c.bf16 %v250_v12, %v248_v11  ;;  %v249_v16 = vld [vmem:[#allocation6 + $0x50] sm:$0xff]  ;;  %v252_v17 = vld [vmem:[#allocation6 + $0x68] sm:$0xff]  ;;  %v254_v18 = vld [vmem:[#allocation6 + $0x78] sm:$0xff] }
  0x2b   :  { %918 = vmatprep.subr.bf16.mxu0 %v917_v8  ;;  %978 = vmatprep.subr.bf16.mxu1 %v917_v8  ;;  %v923_v19 = vpack.c.bf16 %v249_v16, %v247_v15  ;;  %v925_v20 = vpack.c.bf16 %v254_v18, %v252_v17  ;;  %v251_v21 = vld [vmem:[#allocation6 + $0x60] sm:$0xff]  ;;  %v253_v22 = vld [vmem:[#allocation6 + $0x70] sm:$0xff]  ;;  %v256_v23 = vld [vmem:[#allocation6 + $0x88] sm:$0xff] }
  0x2c   :  { %v258_v24 = vld [vmem:[#allocation6 + $0x98] sm:$0xff]  ;;  %v927_v25 = vpack.c.bf16 %v253_v22, %v251_v21  ;;  %v255_v27 = vld [vmem:[#allocation6 + $0x80] sm:$0xff]  ;;  %v257_v28 = vld [vmem:[#allocation6 + $0x90] sm:$0xff] }
  0x2d   :  { %v929_v26 = vpack.c.bf16 %v258_v24, %v256_v23  ;;  %v260_v29 = vld [vmem:[#allocation6 + $0xa8] sm:$0xff]  ;;  %v262_v30 = vld [vmem:[#allocation6 + $0xb8] sm:$0xff]  ;;  %v931_v31 = vpack.c.bf16 %v257_v28, %v255_v27  ;;  %v259_v33 = vld [vmem:[#allocation6 + $0xa0] sm:$0xff] }
  0x2e   :  { %920 = vmatpush1.bf16.msra.mxu0 %v919_v13  ;;  %994 = vmatpush1.bf16.msra.mxu1 %v919_v13  ;;  %v933_v32 = vpack.c.bf16 %v262_v30, %v260_v29  ;;  %v261_v34 = vld [vmem:[#allocation6 + $0xb0] sm:$0xff]  ;;  %v264_v35 = vld [vmem:[#allocation6 + $0xc8] sm:$0xff]  ;;  %v266_v36 = vld [vmem:[#allocation6 + $0xd8] sm:$0xff] }
  0x2f   :  { %922 = vmatprep.subr.bf16.mxu0 %v921_v14  ;;  %979 = vmatprep.subr.bf16.mxu1 %v921_v14  ;;  %v935_v37 = vpack.c.bf16 %v261_v34, %v259_v33  ;;  %v263_v38 = vld [vmem:[#allocation6 + $0xc0] sm:$0xff]  ;;  %v937_v39 = vpack.c.bf16 %v266_v36, %v264_v35  ;;  %v265_v40 = vld [vmem:[#allocation6 + $0xd0] sm:$0xff]  ;;  %v176_v41 = vld [vmem:[#allocation3 + $0x8] sm:$0xff] }
  0x30   :  { %v208_v42 = vld [vmem:[#allocation3 + $0x108] sm:$0xff]  ;;  %v270_v44 = vld [vmem:[#allocation6 + $0xf8] sm:$0xff]  ;;  %367 = vmatprep.mubr.f32.mxu0 %v176_v41  ;;  %v939_v45 = vpack.c.bf16 %v265_v40, %v263_v38  ;;  %v267_v47 = vld [vmem:[#allocation6 + $0xe0] sm:$0xff] }
  0x31   :  { %v268_v43 = vld [vmem:[#allocation6 + $0xe8] sm:$0xff]  ;;  %463 = vmatprep.mubr.f32.mxu1 %v208_v42  ;;  %v269_v48 = vld [vmem:[#allocation6 + $0xf0] sm:$0xff]  ;;  %v274_v50 = vld [vmem:[#allocation6 + $0x118] sm:$0xff] }
  0x32   :  { %924 = vmatpush1.bf16.msra.mxu0 %v923_v19  ;;  %995 = vmatpush1.bf16.msra.mxu1 %v923_v19  ;;  %v941_v46 = vpack.c.bf16 %v270_v44, %v268_v43  ;;  %v272_v49 = vld [vmem:[#allocation6 + $0x108] sm:$0xff]  ;;  %v943_v51 = vpack.c.bf16 %v269_v48, %v267_v47  ;;  %v271_v53 = vld [vmem:[#allocation6 + $0x100] sm:$0xff]  ;;  %v273_v54 = vld [vmem:[#allocation6 + $0x110] sm:$0xff] }
  0x33   :  { %926 = vmatprep.subr.bf16.mxu0 %v925_v20  ;;  %980 = vmatprep.subr.bf16.mxu1 %v925_v20  ;;  %v945_v52 = vpack.c.bf16 %v274_v50, %v272_v49  ;;  %v276_v55 = vld [vmem:[#allocation6 + $0x128] sm:$0xff]  ;;  %v278_v56 = vld [vmem:[#allocation6 + $0x138] sm:$0xff]  ;;  %v947_v57 = vpack.c.bf16 %v273_v54, %v271_v53  ;;  %v275_v59 = vld [vmem:[#allocation6 + $0x120] sm:$0xff] }
  0x34   :  { %v949_v58 = vpack.c.bf16 %v278_v56, %v276_v55  ;;  %v277_v60 = vld [vmem:[#allocation6 + $0x130] sm:$0xff]  ;;  %v280_v61 = vld [vmem:[#allocation6 + $0x148] sm:$0xff]  ;;  %v282_v62 = vld [vmem:[#allocation6 + $0x158] sm:$0xff] }
  0x35   :  { %v951_v63 = vpack.c.bf16 %v277_v60, %v275_v59  ;;  %v953_v0 = vpack.c.bf16 %v282_v62, %v280_v61  ;;  %v279_v1 = vld [vmem:[#allocation6 + $0x140] sm:$0xff]  ;;  %v281_v2 = vld [vmem:[#allocation6 + $0x150] sm:$0xff]  ;;  %v284_v3 = vld [vmem:[#allocation6 + $0x168] sm:$0xff] }
  0x36   :  { %928 = vmatpush1.bf16.msra.mxu0 %v927_v25  ;;  %996 = vmatpush1.bf16.msra.mxu1 %v927_v25  ;;  %v286_v4 = vld [vmem:[#allocation6 + $0x178] sm:$0xff]  ;;  %v955_v5 = vpack.c.bf16 %v281_v2, %v279_v1  ;;  %v283_v7 = vld [vmem:[#allocation6 + $0x160] sm:$0xff]  ;;  %v285_v8 = vld [vmem:[#allocation6 + $0x170] sm:$0xff] }
  0x37   :  { %930 = vmatprep.subr.bf16.mxu0 %v929_v26  ;;  %981 = vmatprep.subr.bf16.mxu1 %v929_v26  ;;  %v957_v6 = vpack.c.bf16 %v286_v4, %v284_v3  ;;  %v288_v9 = vld [vmem:[#allocation6 + $0x188] sm:$0xff]  ;;  %v290_v10 = vld [vmem:[#allocation6 + $0x198] sm:$0xff]  ;;  %v959_v11 = vpack.c.bf16 %v285_v8, %v283_v7  ;;  %v287_v13 = vld [vmem:[#allocation6 + $0x180] sm:$0xff] }
  0x38   :  { %v961_v12 = vpack.c.bf16 %v290_v10, %v288_v9  ;;  %v289_v14 = vld [vmem:[#allocation6 + $0x190] sm:$0xff]  ;;  %v292_v15 = vld [vmem:[#allocation6 + $0x1a8] sm:$0xff]  ;;  %v294_v16 = vld [vmem:[#allocation6 + $0x1b8] sm:$0xff] }
  0x39   :  { %v963_v17 = vpack.c.bf16 %v289_v14, %v287_v13  ;;  %v965_v18 = vpack.c.bf16 %v294_v16, %v292_v15  ;;  %v291_v19 = vld [vmem:[#allocation6 + $0x1a0] sm:$0xff]  ;;  %v293_v20 = vld [vmem:[#allocation6 + $0x1b0] sm:$0xff]  ;;  %v296_v21 = vld [vmem:[#allocation6 + $0x1c8] sm:$0xff] }
  0x3a   :  { %932 = vmatpush1.bf16.msra.mxu0 %v931_v31  ;;  %997 = vmatpush1.bf16.msra.mxu1 %v931_v31  ;;  %v298_v22 = vld [vmem:[#allocation6 + $0x1d8] sm:$0xff]  ;;  %v967_v23 = vpack.c.bf16 %v293_v20, %v291_v19  ;;  %v295_v25 = vld [vmem:[#allocation6 + $0x1c0] sm:$0xff]  ;;  %v297_v26 = vld [vmem:[#allocation6 + $0x1d0] sm:$0xff] }
  0x3b   :  { %934 = vmatprep.subr.bf16.mxu0 %v933_v32  ;;  %982 = vmatprep.subr.bf16.mxu1 %v933_v32  ;;  %v969_v24 = vpack.c.bf16 %v298_v22, %v296_v21  ;;  %v300_v27 = vld [vmem:[#allocation6 + $0x1e8] sm:$0xff]  ;;  %v302_v28 = vld [vmem:[#allocation6 + $0x1f8] sm:$0xff]  ;;  %v971_v29 = vpack.c.bf16 %v297_v26, %v295_v25  ;;  %v299_v31 = vld [vmem:[#allocation6 + $0x1e0] sm:$0xff] }
  0x3c   :  { %v973_v30 = vpack.c.bf16 %v302_v28, %v300_v27  ;;  %v301_v32 = vld [vmem:[#allocation6 + $0x1f0] sm:$0xff]  ;;  %v175_v34 = vld [vmem:[#allocation3] sm:$0xff]  ;;  %v178_v36 = vld [vmem:[#allocation3 + $0x18] sm:$0xff] }
  0x3d   :  { %v975_v33 = vpack.c.bf16 %v301_v32, %v299_v31  ;;  %v207_v35 = vld [vmem:[#allocation3 + $0x100] sm:$0xff]  ;;  %v177_v38 = vld [vmem:[#allocation3 + $0x10] sm:$0xff]  ;;  %v180_v40 = vld [vmem:[#allocation3 + $0x28] sm:$0xff]  ;;  %v757_v32 = vlaneseq }
  0x3e   :  { %936 = vmatpush1.bf16.msra.mxu0 %v935_v37  ;;  %998 = vmatpush1.bf16.msra.mxu1 %v935_v37  ;;  %v210_v37 = vld [vmem:[#allocation3 + $0x118] sm:$0xff]  ;;  %v212_v41 = vld [vmem:[#allocation3 + $0x128] sm:$0xff]  ;;  %v179_v42 = vld [vmem:[#allocation3 + $0x20] sm:$0xff] }
  0x3f   :  { %938 = vmatprep.subr.bf16.mxu0 %v937_v39  ;;  %983 = vmatprep.subr.bf16.mxu1 %v937_v39  ;;  %v209_v39 = vld [vmem:[#allocation3 + $0x110] sm:$0xff]  ;;  %v211_v43 = vld [vmem:[#allocation3 + $0x120] sm:$0xff]  ;;  %v182_v44 = vld [vmem:[#allocation3 + $0x38] sm:$0xff] }
  0x40   :  { %v213_v47 = vld [vmem:[#allocation3 + $0x130] sm:$0xff]  ;;  %v184_v48 = vld [vmem:[#allocation3 + $0x48] sm:$0xff]  ;;  %v183_v50 = vld [vmem:[#allocation3 + $0x40] sm:$0xff] }
  0x41   :  { %v216_v49 = vld [vmem:[#allocation3 + $0x148] sm:$0xff]  ;;  %v218_v53 = vld [vmem:[#allocation3 + $0x158] sm:$0xff]  ;;  %v185_v54 = vld [vmem:[#allocation3 + $0x50] sm:$0xff] }
  0x42   :  { %940 = vmatpush1.bf16.msra.mxu0 %v939_v45  ;;  %999 = vmatpush1.bf16.msra.mxu1 %v939_v45  ;;  %v214_v45 = vld [vmem:[#allocation3 + $0x138] sm:$0xff]  ;;  %v217_v55 = vld [vmem:[#allocation3 + $0x150] sm:$0xff]  ;;  %v188_v56 = vld [vmem:[#allocation3 + $0x68] sm:$0xff] }
  0x43   :  { %942 = vmatprep.subr.bf16.mxu0 %v941_v46  ;;  %984 = vmatprep.subr.bf16.mxu1 %v941_v46  ;;  %v181_v46 = vld [vmem:[#allocation3 + $0x30] sm:$0xff]  ;;  %v219_v59 = vld [vmem:[#allocation3 + $0x160] sm:$0xff]  ;;  %v190_v60 = vld [vmem:[#allocation3 + $0x78] sm:$0xff] }
  0x44   :  { %v222_v61 = vld [vmem:[#allocation3 + $0x178] sm:$0xff]  ;;  %v189_v62 = vld [vmem:[#allocation3 + $0x70] sm:$0xff]  ;;  %v224_v1 = vld [vmem:[#allocation3 + $0x188] sm:$0xff] }
  0x45   :  { %v191_v2 = vld [vmem:[#allocation3 + $0x80] sm:$0xff]  ;;  %v194_v4 = vld [vmem:[#allocation3 + $0x98] sm:$0xff]  ;;  %v225_v7 = vld [vmem:[#allocation3 + $0x190] sm:$0xff] }
  0x46   :  { %944 = vmatpush1.bf16.msra.mxu0 %v943_v51  ;;  %1000 = vmatpush1.bf16.msra.mxu1 %v943_v51  ;;  %v215_v51 = vld [vmem:[#allocation3 + $0x140] sm:$0xff]  ;;  %v196_v8 = vld [vmem:[#allocation3 + $0xa8] sm:$0xff]  ;;  %v230_v13 = vld [vmem:[#allocation3 + $0x1b8] sm:$0xff] }
  0x47   :  { %946 = vmatprep.subr.bf16.mxu0 %v945_v52  ;;  %985 = vmatprep.subr.bf16.mxu1 %v945_v52  ;;  %v186_v52 = vld [vmem:[#allocation3 + $0x58] sm:$0xff]  ;;  %v223_v3 = vld [vmem:[#allocation3 + $0x180] sm:$0xff]  ;;  %v228_v9 = vld [vmem:[#allocation3 + $0x1a8] sm:$0xff] }
  0x48   :  { %v195_v10 = vld [vmem:[#allocation3 + $0xa0] sm:$0xff]  ;;  %v197_v14 = vld [vmem:[#allocation3 + $0xb0] sm:$0xff]  ;;  %v200_v16 = vld [vmem:[#allocation3 + $0xc8] sm:$0xff] }
  0x49   :  { %v229_v15 = vld [vmem:[#allocation3 + $0x1b0] sm:$0xff]  ;;  %v231_v19 = vld [vmem:[#allocation3 + $0x1c0] sm:$0xff]  ;;  %v202_v20 = vld [vmem:[#allocation3 + $0xd8] sm:$0xff] }
  0x4a   :  { %948 = vmatpush1.bf16.msra.mxu0 %v947_v57  ;;  %1001 = vmatpush1.bf16.msra.mxu1 %v947_v57  ;;  %v220_v57 = vld [vmem:[#allocation3 + $0x168] sm:$0xff]  ;;  %v234_v21 = vld [vmem:[#allocation3 + $0x1d8] sm:$0xff]  ;;  %v201_v22 = vld [vmem:[#allocation3 + $0xd0] sm:$0xff] }
  0x4b   :  { %950 = vmatprep.subr.bf16.mxu0 %v949_v58  ;;  %986 = vmatprep.subr.bf16.mxu1 %v949_v58  ;;  %v187_v58 = vld [vmem:[#allocation3 + $0x60] sm:$0xff]  ;;  %v236_v25 = vld [vmem:[#allocation3 + $0x1e8] sm:$0xff]  ;;  %v206_v28 = vld [vmem:[#allocation3 + $0xf8] sm:$0xff] }
  0x4c   :  { %v203_v26 = vld [vmem:[#allocation3 + $0xe0] sm:$0xff]  ;;  %v237_v31 = vld [vmem:[#allocation3 + $0x1f0] sm:$0xff] }
  0x4d   :  { %v235_v27 = vld [vmem:[#allocation3 + $0x1e0] sm:$0xff] }
  0x4e   :  { %952 = vmatpush1.bf16.msra.mxu0 %v951_v63  ;;  %1002 = vmatpush1.bf16.msra.mxu1 %v951_v63  ;;  %v221_v63 = vld [vmem:[#allocation3 + $0x170] sm:$0xff] }
  0x4f   :  { %954 = vmatprep.subr.bf16.mxu0 %v953_v0  ;;  %987 = vmatprep.subr.bf16.mxu1 %v953_v0  ;;  %v192_v0 = vld [vmem:[#allocation3 + $0x88] sm:$0xff] }
  0x52   :  { %956 = vmatpush1.bf16.msra.mxu0 %v955_v5  ;;  %1003 = vmatpush1.bf16.msra.mxu1 %v955_v5  ;;  %v226_v5 = vld [vmem:[#allocation3 + $0x198] sm:$0xff] }
  0x53   :  { %958 = vmatprep.subr.bf16.mxu0 %v957_v6  ;;  %988 = vmatprep.subr.bf16.mxu1 %v957_v6  ;;  %v193_v6 = vld [vmem:[#allocation3 + $0x90] sm:$0xff] }
  0x56   :  { %960 = vmatpush1.bf16.msra.mxu0 %v959_v11  ;;  %1004 = vmatpush1.bf16.msra.mxu1 %v959_v11  ;;  %v227_v11 = vld [vmem:[#allocation3 + $0x1a0] sm:$0xff] }
  0x57   :  { %962 = vmatprep.subr.bf16.mxu0 %v961_v12  ;;  %989 = vmatprep.subr.bf16.mxu1 %v961_v12  ;;  %v198_v12 = vld [vmem:[#allocation3 + $0xb8] sm:$0xff] }
  0x5a   :  { %964 = vmatpush1.bf16.msra.mxu0 %v963_v17  ;;  %1005 = vmatpush1.bf16.msra.mxu1 %v963_v17  ;;  %v232_v17 = vld [vmem:[#allocation3 + $0x1c8] sm:$0xff] }
  0x5b   :  { %966 = vmatprep.subr.bf16.mxu0 %v965_v18  ;;  %990 = vmatprep.subr.bf16.mxu1 %v965_v18  ;;  %v199_v18 = vld [vmem:[#allocation3 + $0xc0] sm:$0xff] }
  0x5e   :  { %968 = vmatpush1.bf16.msra.mxu0 %v967_v23  ;;  %1006 = vmatpush1.bf16.msra.mxu1 %v967_v23  ;;  %v233_v23 = vld [vmem:[#allocation3 + $0x1d0] sm:$0xff] }
  0x5f   :  { %970 = vmatprep.subr.bf16.mxu0 %v969_v24  ;;  %991 = vmatprep.subr.bf16.mxu1 %v969_v24  ;;  %v204_v24 = vld [vmem:[#allocation3 + $0xe8] sm:$0xff] }
  0x62   :  { %972 = vmatpush1.bf16.msra.mxu0 %v971_v29  ;;  %1007 = vmatpush1.bf16.msra.mxu1 %v971_v29  ;;  %v238_v29 = vld [vmem:[#allocation3 + $0x1f8] sm:$0xff] }
  0x63   :  { %974 = vmatprep.subr.bf16.mxu0 %v973_v30  ;;  %992 = vmatprep.subr.bf16.mxu1 %v973_v30  ;;  %v205_v30 = vld [vmem:[#allocation3 + $0xf0] sm:$0xff] }
  0x66   :  { %976 = vmatpush1.bf16.msra.mxu0 %v975_v33  ;;  %1008 = vmatpush1.bf16.msra.mxu1 %v975_v33  ;;  %v758_v33 = vshrl.u32 %v757_v32, 7 }
  0x69   :  { %368 = vmatmul.mubr.f32.vlgmr.msra.gmra.mrb[0].mxu0 %v175_v34  ;;  %464 = vmatmul.mubr.f32.vlgmr.msra.gmra.mrb[0].mxu1 %v207_v35  ;;  %v759_v34 = vsub.s32 0, %v758_v33  ;;  %v755_v35 = vld [vmem:[%s1229_s2] sm:$0x3]  ;;  %s1090_s2 = smov [#allocation8]  }
  0x6a   :  { %373 = vmatprep.mubr.f32.mxu0 %v178_v36  ;;  %469 = vmatprep.mubr.f32.mxu1 %v210_v37  ;;  %v763_v36 = vsub.s32 1, %v758_v33  ;;  %s900_s11 = sshll.u32 %s1090_s2, 4  ;;  %s901_s11 = int_to_ptr.vmem [resolvable:$true] %s900_s11 }
  0x6b   :  { %v1144_v37 = vrot.slane %v755_v35, %v759_v34  ;;  %s1058_s12 = scalar_lea.vmem %s901_s11, 8192  ;;  %p1063_p3 = scmp.lt.s32.totalorder %s901_s11, %s901_s11 }
  0x6c   :  { %p1059_p2 = scmp.ne.s32.totalorder %s901_s11, %s1058_s12  ;;  %p1064_p4 = scmp.lt.s32.totalorder %s1058_s12, %s1058_s12 }
  0x6d   :  { %374 = vmatmul.mubr.f32.gmra.mrb[2].mxu0 %v177_v38  ;;  %470 = vmatmul.mubr.f32.gmra.mrb[2].mxu1 %v209_v39  ;;  %v1146_v38 = vrot.slane %v755_v35, %v763_v36 }
  0x6e   :  { %379 = vmatprep.mubr.f32.mxu0 %v180_v40  ;;  %475 = vmatprep.mubr.f32.mxu1 %v212_v41  ;;  %p1065_p5 = por %p1064_p4, %p1063_p3 }
  0x70   :  { %p1066_p6 = pnand %p1065_p5, %p1059_p2 }
  0x71   :  { %380 = vmatmul.mubr.f32.gmra.mrb[4].mxu0 %v179_v42  ;;  %476 = vmatmul.mubr.f32.gmra.mrb[4].mxu1 %v211_v43 }
  0x72   :  { %385 = vmatprep.mubr.f32.mxu0 %v182_v44  ;;  %481 = vmatprep.mubr.f32.mxu1 %v214_v45 }
  0x75   :  { %386 = vmatmul.mubr.f32.gmra.mrb[6].mxu0 %v181_v46  ;;  %482 = vmatmul.mubr.f32.gmra.mrb[6].mxu1 %v213_v47 }
  0x76   :  { %391 = vmatprep.mubr.f32.mxu0 %v184_v48  ;;  %487 = vmatprep.mubr.f32.mxu1 %v216_v49 }
  0x79   :  { %392 = vmatmul.mubr.f32.gmra.mrb[8].mxu0 %v183_v50  ;;  %488 = vmatmul.mubr.f32.gmra.mrb[8].mxu1 %v215_v51 }
  0x7a   :  { %397 = vmatprep.mubr.f32.mxu0 %v186_v52  ;;  %493 = vmatprep.mubr.f32.mxu1 %v218_v53 }
  0x7d   :  { %398 = vmatmul.mubr.f32.gmra.mrb[10].mxu0 %v185_v54  ;;  %494 = vmatmul.mubr.f32.gmra.mrb[10].mxu1 %v217_v55 }
  0x7e   :  { %403 = vmatprep.mubr.f32.mxu0 %v188_v56  ;;  %499 = vmatprep.mubr.f32.mxu1 %v220_v57 }
  0x81   :  { %404 = vmatmul.mubr.f32.gmra.mrb[12].mxu0 %v187_v58  ;;  %500 = vmatmul.mubr.f32.gmra.mrb[12].mxu1 %v219_v59 }
  0x82   :  { %409 = vmatprep.mubr.f32.mxu0 %v190_v60  ;;  %505 = vmatprep.mubr.f32.mxu1 %v222_v61 }
  0x85   :  { %410 = vmatmul.mubr.f32.gmra.mrb[14].mxu0 %v189_v62  ;;  %506 = vmatmul.mubr.f32.gmra.mrb[14].mxu1 %v221_v63 }
  0x86   :  { %415 = vmatprep.mubr.f32.mxu0 %v192_v0  ;;  %511 = vmatprep.mubr.f32.mxu1 %v224_v1 }
  0x89   :  { %416 = vmatmul.mubr.f32.gmra.mrb[16].mxu0 %v191_v2  ;;  %512 = vmatmul.mubr.f32.gmra.mrb[16].mxu1 %v223_v3 }
  0x8a   :  { %421 = vmatprep.mubr.f32.mxu0 %v194_v4  ;;  %517 = vmatprep.mubr.f32.mxu1 %v226_v5 }
  0x8d   :  { %422 = vmatmul.mubr.f32.gmra.mrb[18].mxu0 %v193_v6  ;;  %518 = vmatmul.mubr.f32.gmra.mrb[18].mxu1 %v225_v7 }
  0x8e   :  { %427 = vmatprep.mubr.f32.mxu0 %v196_v8  ;;  %523 = vmatprep.mubr.f32.mxu1 %v228_v9 }
  0x91   :  { %428 = vmatmul.mubr.f32.gmra.mrb[20].mxu0 %v195_v10  ;;  %524 = vmatmul.mubr.f32.gmra.mrb[20].mxu1 %v227_v11 }
  0x92   :  { %433 = vmatprep.mubr.f32.mxu0 %v198_v12  ;;  %529 = vmatprep.mubr.f32.mxu1 %v230_v13 }
  0x95   :  { %434 = vmatmul.mubr.f32.gmra.mrb[22].mxu0 %v197_v14  ;;  %530 = vmatmul.mubr.f32.gmra.mrb[22].mxu1 %v229_v15 }
  0x96   :  { %439 = vmatprep.mubr.f32.mxu0 %v200_v16  ;;  %535 = vmatprep.mubr.f32.mxu1 %v232_v17 }
  0x99   :  { %440 = vmatmul.mubr.f32.gmra.mrb[24].mxu0 %v199_v18  ;;  %536 = vmatmul.mubr.f32.gmra.mrb[24].mxu1 %v231_v19 }
  0x9a   :  { %445 = vmatprep.mubr.f32.mxu0 %v202_v20  ;;  %541 = vmatprep.mubr.f32.mxu1 %v234_v21 }
  0x9d   :  { %446 = vmatmul.mubr.f32.gmra.mrb[26].mxu0 %v201_v22  ;;  %542 = vmatmul.mubr.f32.gmra.mrb[26].mxu1 %v233_v23 }
  0x9e   :  { %451 = vmatprep.mubr.f32.mxu0 %v204_v24  ;;  %547 = vmatprep.mubr.f32.mxu1 %v236_v25 }
  0xa1   :  { %452 = vmatmul.mubr.f32.gmra.mrb[28].mxu0 %v203_v26  ;;  %548 = vmatmul.mubr.f32.gmra.mrb[28].mxu1 %v235_v27 }
  0xa2   :  { %457 = vmatprep.mubr.f32.mxu0 %v206_v28  ;;  %553 = vmatprep.mubr.f32.mxu1 %v238_v29 }
  0xa5   :  { %458 = vmatmul.mubr.f32.gmra.mrb[30].mxu0 %v205_v30  ;;  %554 = vmatmul.mubr.f32.gmra.mrb[30].mxu1 %v237_v31 }
 0x13c   :  { %v369_v39 = vpop.f32.mrb[0].mxu0  ;;  %v465_v40 = vpop.f32.mrb[0].mxu1 }
 0x13d   :  { %v767_v41 = vadd.f32 %v1144_v37, %v369_v39  ;;  %v799_v42 = vadd.f32 %v1144_v37, %v465_v40  ;;  %v371_v43 = vpop.f32.mrb[1].mxu0  ;;  %v467_v44 = vpop.f32.mrb[1].mxu1 }
 0x13e   :  { %v768_v45 = vadd.f32 %v1146_v38, %v371_v43  ;;  %v800_v46 = vadd.f32 %v1146_v38, %v467_v44 }
 0x13f   :  { %831 = vst [vmem:[#allocation8] sm:$0xff] %v767_v41  ;;  %863 = vst [vmem:[#allocation8 + $0x100] sm:$0xff] %v799_v42 }
 0x140   :  { %832 = vst [vmem:[#allocation8 + $0x8] sm:$0xff] %v768_v45  ;;  %864 = vst [vmem:[#allocation8 + $0x108] sm:$0xff] %v800_v46  ;;  %v375_v47 = vpop.f32.mrb[2].mxu0  ;;  %v471_v48 = vpop.f32.mrb[2].mxu1 }
 0x141   :  { %v769_v49 = vadd.f32 %v1144_v37, %v375_v47  ;;  %v801_v50 = vadd.f32 %v1144_v37, %v471_v48  ;;  %v377_v51 = vpop.f32.mrb[3].mxu0  ;;  %v473_v52 = vpop.f32.mrb[3].mxu1 }
 0x142   :  { %v770_v53 = vadd.f32 %v1146_v38, %v377_v51  ;;  %v802_v54 = vadd.f32 %v1146_v38, %v473_v52 }
 0x143   :  { %833 = vst [vmem:[#allocation8 + $0x10] sm:$0xff] %v769_v49  ;;  %865 = vst [vmem:[#allocation8 + $0x110] sm:$0xff] %v801_v50 }
 0x144   :  { %834 = vst [vmem:[#allocation8 + $0x18] sm:$0xff] %v770_v53  ;;  %866 = vst [vmem:[#allocation8 + $0x118] sm:$0xff] %v802_v54  ;;  %v381_v55 = vpop.f32.mrb[4].mxu0  ;;  %v477_v56 = vpop.f32.mrb[4].mxu1 }
 0x145   :  { %v771_v57 = vadd.f32 %v1144_v37, %v381_v55  ;;  %v803_v58 = vadd.f32 %v1144_v37, %v477_v56  ;;  %v383_v59 = vpop.f32.mrb[5].mxu0  ;;  %v479_v60 = vpop.f32.mrb[5].mxu1 }
 0x146   :  { %v772_v61 = vadd.f32 %v1146_v38, %v383_v59  ;;  %v804_v62 = vadd.f32 %v1146_v38, %v479_v60 }
 0x147   :  { %835 = vst [vmem:[#allocation8 + $0x20] sm:$0xff] %v771_v57  ;;  %867 = vst [vmem:[#allocation8 + $0x120] sm:$0xff] %v803_v58 }
 0x148   :  { %836 = vst [vmem:[#allocation8 + $0x28] sm:$0xff] %v772_v61  ;;  %868 = vst [vmem:[#allocation8 + $0x128] sm:$0xff] %v804_v62  ;;  %v387_v63 = vpop.f32.mrb[6].mxu0  ;;  %v483_v0 = vpop.f32.mrb[6].mxu1 }
 0x149   :  { %v773_v1 = vadd.f32 %v1144_v37, %v387_v63  ;;  %v805_v2 = vadd.f32 %v1144_v37, %v483_v0  ;;  %v389_v3 = vpop.f32.mrb[7].mxu0  ;;  %v485_v4 = vpop.f32.mrb[7].mxu1 }
 0x14a   :  { %v774_v5 = vadd.f32 %v1146_v38, %v389_v3  ;;  %v806_v6 = vadd.f32 %v1146_v38, %v485_v4 }
 0x14b   :  { %837 = vst [vmem:[#allocation8 + $0x30] sm:$0xff] %v773_v1  ;;  %869 = vst [vmem:[#allocation8 + $0x130] sm:$0xff] %v805_v2 }
 0x14c   :  { %838 = vst [vmem:[#allocation8 + $0x38] sm:$0xff] %v774_v5  ;;  %870 = vst [vmem:[#allocation8 + $0x138] sm:$0xff] %v806_v6  ;;  %v393_v7 = vpop.f32.mrb[8].mxu0  ;;  %v489_v8 = vpop.f32.mrb[8].mxu1 }
 0x14d   :  { %v775_v9 = vadd.f32 %v1144_v37, %v393_v7  ;;  %v807_v10 = vadd.f32 %v1144_v37, %v489_v8  ;;  %v395_v11 = vpop.f32.mrb[9].mxu0  ;;  %v491_v12 = vpop.f32.mrb[9].mxu1 }
 0x14e   :  { %v776_v13 = vadd.f32 %v1146_v38, %v395_v11  ;;  %v808_v14 = vadd.f32 %v1146_v38, %v491_v12 }
 0x14f   :  { %839 = vst [vmem:[#allocation8 + $0x40] sm:$0xff] %v775_v9  ;;  %871 = vst [vmem:[#allocation8 + $0x140] sm:$0xff] %v807_v10 }
 0x150   :  { %840 = vst [vmem:[#allocation8 + $0x48] sm:$0xff] %v776_v13  ;;  %872 = vst [vmem:[#allocation8 + $0x148] sm:$0xff] %v808_v14  ;;  %v399_v15 = vpop.f32.mrb[10].mxu0  ;;  %v495_v16 = vpop.f32.mrb[10].mxu1 }
 0x151   :  { %v777_v17 = vadd.f32 %v1144_v37, %v399_v15  ;;  %v809_v18 = vadd.f32 %v1144_v37, %v495_v16  ;;  %v401_v19 = vpop.f32.mrb[11].mxu0  ;;  %v497_v20 = vpop.f32.mrb[11].mxu1 }
 0x152   :  { %v778_v21 = vadd.f32 %v1146_v38, %v401_v19  ;;  %v810_v22 = vadd.f32 %v1146_v38, %v497_v20 }
 0x153   :  { %841 = vst [vmem:[#allocation8 + $0x50] sm:$0xff] %v777_v17  ;;  %873 = vst [vmem:[#allocation8 + $0x150] sm:$0xff] %v809_v18 }
 0x154   :  { %842 = vst [vmem:[#allocation8 + $0x58] sm:$0xff] %v778_v21  ;;  %874 = vst [vmem:[#allocation8 + $0x158] sm:$0xff] %v810_v22  ;;  %v405_v23 = vpop.f32.mrb[12].mxu0  ;;  %v501_v24 = vpop.f32.mrb[12].mxu1 }
 0x155   :  { %v779_v25 = vadd.f32 %v1144_v37, %v405_v23  ;;  %v811_v26 = vadd.f32 %v1144_v37, %v501_v24  ;;  %v407_v27 = vpop.f32.mrb[13].mxu0  ;;  %v503_v28 = vpop.f32.mrb[13].mxu1 }
 0x156   :  { %v780_v29 = vadd.f32 %v1146_v38, %v407_v27  ;;  %v812_v30 = vadd.f32 %v1146_v38, %v503_v28 }
 0x157   :  { %843 = vst [vmem:[#allocation8 + $0x60] sm:$0xff] %v779_v25  ;;  %875 = vst [vmem:[#allocation8 + $0x160] sm:$0xff] %v811_v26 }
 0x158   :  { %844 = vst [vmem:[#allocation8 + $0x68] sm:$0xff] %v780_v29  ;;  %876 = vst [vmem:[#allocation8 + $0x168] sm:$0xff] %v812_v30  ;;  %v411_v31 = vpop.f32.mrb[14].mxu0  ;;  %v507_v32 = vpop.f32.mrb[14].mxu1 }
 0x159   :  { %v781_v33 = vadd.f32 %v1144_v37, %v411_v31  ;;  %v813_v34 = vadd.f32 %v1144_v37, %v507_v32  ;;  %v413_v35 = vpop.f32.mrb[15].mxu0  ;;  %v509_v36 = vpop.f32.mrb[15].mxu1 }
 0x15a   :  { %v782_v39 = vadd.f32 %v1146_v38, %v413_v35  ;;  %v814_v40 = vadd.f32 %v1146_v38, %v509_v36 }
 0x15b   :  { %845 = vst [vmem:[#allocation8 + $0x70] sm:$0xff] %v781_v33  ;;  %877 = vst [vmem:[#allocation8 + $0x170] sm:$0xff] %v813_v34 }
 0x15c   :  { %846 = vst [vmem:[#allocation8 + $0x78] sm:$0xff] %v782_v39  ;;  %878 = vst [vmem:[#allocation8 + $0x178] sm:$0xff] %v814_v40  ;;  %v417_v41 = vpop.f32.mrb[16].mxu0  ;;  %v513_v42 = vpop.f32.mrb[16].mxu1 }
 0x15d   :  { %v783_v43 = vadd.f32 %v1144_v37, %v417_v41  ;;  %v815_v44 = vadd.f32 %v1144_v37, %v513_v42  ;;  %v419_v45 = vpop.f32.mrb[17].mxu0  ;;  %v515_v46 = vpop.f32.mrb[17].mxu1 }
 0x15e   :  { %v784_v47 = vadd.f32 %v1146_v38, %v419_v45  ;;  %v816_v48 = vadd.f32 %v1146_v38, %v515_v46 }
 0x15f   :  { %847 = vst [vmem:[#allocation8 + $0x80] sm:$0xff] %v783_v43  ;;  %879 = vst [vmem:[#allocation8 + $0x180] sm:$0xff] %v815_v44 }
 0x160   :  { %848 = vst [vmem:[#allocation8 + $0x88] sm:$0xff] %v784_v47  ;;  %880 = vst [vmem:[#allocation8 + $0x188] sm:$0xff] %v816_v48  ;;  %v423_v49 = vpop.f32.mrb[18].mxu0  ;;  %v519_v50 = vpop.f32.mrb[18].mxu1 }
 0x161   :  { %v785_v51 = vadd.f32 %v1144_v37, %v423_v49  ;;  %v817_v52 = vadd.f32 %v1144_v37, %v519_v50  ;;  %v425_v53 = vpop.f32.mrb[19].mxu0  ;;  %v521_v54 = vpop.f32.mrb[19].mxu1 }
 0x162   :  { %v786_v55 = vadd.f32 %v1146_v38, %v425_v53  ;;  %v818_v56 = vadd.f32 %v1146_v38, %v521_v54 }
 0x163   :  { %849 = vst [vmem:[#allocation8 + $0x90] sm:$0xff] %v785_v51  ;;  %881 = vst [vmem:[#allocation8 + $0x190] sm:$0xff] %v817_v52 }
 0x164   :  { %850 = vst [vmem:[#allocation8 + $0x98] sm:$0xff] %v786_v55  ;;  %882 = vst [vmem:[#allocation8 + $0x198] sm:$0xff] %v818_v56  ;;  %v429_v57 = vpop.f32.mrb[20].mxu0  ;;  %v525_v58 = vpop.f32.mrb[20].mxu1 }
 0x165   :  { %v787_v59 = vadd.f32 %v1144_v37, %v429_v57  ;;  %v819_v60 = vadd.f32 %v1144_v37, %v525_v58  ;;  %v431_v61 = vpop.f32.mrb[21].mxu0  ;;  %v527_v62 = vpop.f32.mrb[21].mxu1 }
 0x166   :  { %v788_v63 = vadd.f32 %v1146_v38, %v431_v61  ;;  %v820_v0 = vadd.f32 %v1146_v38, %v527_v62 }
 0x167   :  { %851 = vst [vmem:[#allocation8 + $0xa0] sm:$0xff] %v787_v59  ;;  %883 = vst [vmem:[#allocation8 + $0x1a0] sm:$0xff] %v819_v60 }
 0x168   :  { %852 = vst [vmem:[#allocation8 + $0xa8] sm:$0xff] %v788_v63  ;;  %884 = vst [vmem:[#allocation8 + $0x1a8] sm:$0xff] %v820_v0  ;;  %v435_v1 = vpop.f32.mrb[22].mxu0  ;;  %v531_v2 = vpop.f32.mrb[22].mxu1 }
 0x169   :  { %v789_v3 = vadd.f32 %v1144_v37, %v435_v1  ;;  %v821_v4 = vadd.f32 %v1144_v37, %v531_v2  ;;  %v437_v5 = vpop.f32.mrb[23].mxu0  ;;  %v533_v6 = vpop.f32.mrb[23].mxu1 }
 0x16a   :  { %v790_v7 = vadd.f32 %v1146_v38, %v437_v5  ;;  %v822_v8 = vadd.f32 %v1146_v38, %v533_v6 }
 0x16b   :  { %853 = vst [vmem:[#allocation8 + $0xb0] sm:$0xff] %v789_v3  ;;  %885 = vst [vmem:[#allocation8 + $0x1b0] sm:$0xff] %v821_v4 }
 0x16c   :  { %854 = vst [vmem:[#allocation8 + $0xb8] sm:$0xff] %v790_v7  ;;  %886 = vst [vmem:[#allocation8 + $0x1b8] sm:$0xff] %v822_v8  ;;  %v441_v9 = vpop.f32.mrb[24].mxu0  ;;  %v537_v10 = vpop.f32.mrb[24].mxu1 }
 0x16d   :  { %v791_v11 = vadd.f32 %v1144_v37, %v441_v9  ;;  %v823_v12 = vadd.f32 %v1144_v37, %v537_v10  ;;  %v443_v13 = vpop.f32.mrb[25].mxu0  ;;  %v539_v14 = vpop.f32.mrb[25].mxu1 }
 0x16e   :  { %v792_v15 = vadd.f32 %v1146_v38, %v443_v13  ;;  %v824_v16 = vadd.f32 %v1146_v38, %v539_v14 }
 0x16f   :  { %855 = vst [vmem:[#allocation8 + $0xc0] sm:$0xff] %v791_v11  ;;  %887 = vst [vmem:[#allocation8 + $0x1c0] sm:$0xff] %v823_v12 }
 0x170   :  { %856 = vst [vmem:[#allocation8 + $0xc8] sm:$0xff] %v792_v15  ;;  %888 = vst [vmem:[#allocation8 + $0x1c8] sm:$0xff] %v824_v16  ;;  %v447_v17 = vpop.f32.mrb[26].mxu0  ;;  %v543_v18 = vpop.f32.mrb[26].mxu1 }
 0x171   :  { %v793_v19 = vadd.f32 %v1144_v37, %v447_v17  ;;  %v825_v20 = vadd.f32 %v1144_v37, %v543_v18  ;;  %v449_v21 = vpop.f32.mrb[27].mxu0  ;;  %v545_v22 = vpop.f32.mrb[27].mxu1 }
 0x172   :  { %v794_v23 = vadd.f32 %v1146_v38, %v449_v21  ;;  %v826_v24 = vadd.f32 %v1146_v38, %v545_v22 }
 0x173   :  { %857 = vst [vmem:[#allocation8 + $0xd0] sm:$0xff] %v793_v19  ;;  %889 = vst [vmem:[#allocation8 + $0x1d0] sm:$0xff] %v825_v20 }
 0x174   :  { %858 = vst [vmem:[#allocation8 + $0xd8] sm:$0xff] %v794_v23  ;;  %890 = vst [vmem:[#allocation8 + $0x1d8] sm:$0xff] %v826_v24  ;;  %v453_v25 = vpop.f32.mrb[28].mxu0  ;;  %v549_v26 = vpop.f32.mrb[28].mxu1 }
 0x175   :  { %v795_v27 = vadd.f32 %v1144_v37, %v453_v25  ;;  %v827_v28 = vadd.f32 %v1144_v37, %v549_v26  ;;  %v455_v29 = vpop.f32.mrb[29].mxu0  ;;  %v551_v30 = vpop.f32.mrb[29].mxu1 }
 0x176   :  { %v796_v31 = vadd.f32 %v1146_v38, %v455_v29  ;;  %v828_v32 = vadd.f32 %v1146_v38, %v551_v30 }
 0x177   :  { %859 = vst [vmem:[#allocation8 + $0xe0] sm:$0xff] %v795_v27  ;;  %891 = vst [vmem:[#allocation8 + $0x1e0] sm:$0xff] %v827_v28 }
 0x178   :  { %860 = vst [vmem:[#allocation8 + $0xe8] sm:$0xff] %v796_v31  ;;  %892 = vst [vmem:[#allocation8 + $0x1e8] sm:$0xff] %v828_v32  ;;  %v459_v33 = vpop.f32.mrb[30].mxu0  ;;  %v555_v34 = vpop.f32.mrb[30].mxu1 }
 0x179   :  { %v797_v35 = vadd.f32 %v1144_v37, %v459_v33  ;;  %v829_v36 = vadd.f32 %v1144_v37, %v555_v34  ;;  %v461_v39 = vpop.f32.mrb[31].mxu0  ;;  %v557_v40 = vpop.f32.mrb[31].mxu1 }
 0x17a   :  { %v798_v41 = vadd.f32 %v1146_v38, %v461_v39  ;;  %v830_v42 = vadd.f32 %v1146_v38, %v557_v40 }
 0x17b   :  { %861 = vst [vmem:[#allocation8 + $0xf0] sm:$0xff] %v797_v35  ;;  %893 = vst [vmem:[#allocation8 + $0x1f0] sm:$0xff] %v829_v36 }
 0x17c   :  { %862 = vst [vmem:[#allocation8 + $0xf8] sm:$0xff] %v798_v41  ;;  %894 = vst [vmem:[#allocation8 + $0x1f8] sm:$0xff] %v830_v42 }
 0x17d   :  { %1069 = shalt.err (!%p1066_p6)
}
 0x17e   :  { %s1070_s15 = scalar_lea.hbm %s1230_s3, 8192 }
 0x17f   :  { %p1071_p7 = scmp.ne.s32.totalorder %s1230_s3, %s1070_s15  ;;  %p1074_p8 = scmp.lt.u32.totalorder %s1070_s15, %s1230_s3 }
 0x181   :  { %p1076_p9 = pnand %p1074_p8, %p1071_p7 }
 0x183   :  { %1079 = shalt.err (!%p1076_p9)
}
 0x184   :  { %906 = dma.vmem_to_hbm [thread:$0]  %s901_s11, 8192, %s1230_s3, [#allocation5], %s1087_s22, %s1087_s22, %s1088_s23  }
 0x185   :  { %1084 = dma.done.wait [#allocation5], 8192  }
 0x186   :  { %1085 = vsyncadd [#allocation5], 4294959104 }
 0x187   :  { %910 = vsyncpa [#allocation4], 1 }
 0x188   :  { %911 = vsyncpa [#allocation7], 1 }
 0x189   :  { %912 = vsyncpa [#allocation5], 1 }

</bundles_post_ra>
